<compile_context>
chip_gen: v7x
topology: tpu7x:2x2x1
jax: 0.10.0
libtpu: 0.0.40
codegen_flags: <defaults>
</compile_context>

<pallas_src>
import functools
import math

import jax
import jax.numpy as jnp
from jax import lax
from jax.experimental import pallas as pl
from jax.experimental.pallas import tpu as pltpu


def _cosface_kernel(x_ref, w_ref, inv_xn_s_ref, inv_wn_ref, label_ref, out_ref,
                    *, sm, tile_c):
    # x_ref:        (TILE_B, D)   compute dtype (bf16 by default)
    # w_ref:        (TILE_C, D)   compute dtype, streamed per C tile
    # inv_xn_s_ref: (TILE_B, 1)   f32, s / max(||x||, eps)
    # inv_wn_ref:   (1, TILE_C)   f32, 1 / max(||w||, eps)
    # label_ref:    (TILE_B, 1)   int32
    # out_ref:      (TILE_B, TILE_C) f32
    j = pl.program_id(0)  # class-tile index

    # raw = x @ w.T as an NT dot_general; f32 accumulation on the MXU.
    raw = lax.dot_general(
        x_ref[...], w_ref[...],
        dimension_numbers=(((1,), (1,)), ((), ())),
        preferred_element_type=jnp.float32)                   # (TILE_B, TILE_C)

    # scaled = s * cosine   (s is folded into inv_xn_s in the wrapper).
    scaled = raw * inv_xn_s_ref[...] * inv_wn_ref[...]

    # Margin on the label column: out = s*cosine - s*m on that column.
    col_ids = lax.broadcasted_iota(jnp.int32, scaled.shape, 1) + j * tile_c
    out_ref[...] = jnp.where(col_ids == label_ref[...], scaled - sm, scaled)


def cosface_forward(x, weight, label, s=64.0, m=0.35,
                    tile_c=None, tile_b=None, compute_dtype=jnp.bfloat16):
    """x: (B, D), weight: (C, D), label: (B,) int -> (B, C) float32."""
    B, D = x.shape
    C, D2 = weight.shape
    assert D == D2, "in_features mismatch"

    # ---- Wrapper-side norm precompute (always f32, from the original values).
    # F.normalize(eps=1e-12): v / max(||v||, eps) == v * rsqrt(max(sum(v^2), eps^2)).
    xf = x.astype(jnp.float32)
    wf = weight.astype(jnp.float32)
    inv_xn_s = (s * lax.rsqrt(
        jnp.maximum(jnp.sum(xf * xf, axis=-1, keepdims=True), 1e-24)))   # (B, 1)
    inv_wn = lax.rsqrt(
        jnp.maximum(jnp.sum(wf * wf, axis=-1), 1e-24)).reshape(1, C)     # (1, C)

    x_c = x.astype(compute_dtype)
    w_c = weight.astype(compute_dtype)
    label2d = label.reshape(B, 1).astype(jnp.int32)

    # ---- Tile selection.
    # Class tile: multiple of 128 (lane-dense stores); default 2048, and if the
    # whole (padded) C fits one tile but >= 256, split in two so a 2-TC chip
    # (v7x) has parallel work.  TODO(synk): on v7x budget TILE_C for 64 MiB VMEM.
    c_pad128 = pl.cdiv(C, 128) * 128
    if tile_c is None:
        tile_c = min(2048, c_pad128)
        if tile_c >= c_pad128 and c_pad128 >= 256:
            tile_c = pl.cdiv(c_pad128 // 2, 128) * 128
    tile_c = max(128, (tile_c // 128) * 128)
    c_pad = pl.cdiv(C, tile_c) * tile_c

    # Batch tile: multiple of 8; bounds x/out double-buffer VMEM for large B.
    b_pad8 = pl.cdiv(B, 8) * 8
    if tile_b is None:
        tile_b = min(256, b_pad8)
    tile_b = max(8, (tile_b // 8) * 8)
    b_pad = pl.cdiv(B, tile_b) * tile_b

    # ---- Padding (zeros for data / inv norms, -1 for labels).
    if c_pad != C:
        w_c = jnp.pad(w_c, ((0, c_pad - C), (0, 0)))
        inv_wn = jnp.pad(inv_wn, ((0, 0), (0, c_pad - C)))
    if b_pad != B:
        x_c = jnp.pad(x_c, ((0, b_pad - B), (0, 0)))
        inv_xn_s = jnp.pad(inv_xn_s, ((0, b_pad - B), (0, 0)))
        label2d = jnp.pad(label2d, ((0, b_pad - B), (0, 0)),
                          constant_values=-1)

    n_c_tiles = c_pad // tile_c
    n_b_tiles = b_pad // tile_b

    # ---- VMEM budget (double-buffered tiles + f32 output + small vectors).
    itemsize = jnp.dtype(compute_dtype).itemsize
    est = (2 * tile_c * D * itemsize        # weight double buffer
           + 2 * tile_b * D * itemsize      # x double buffer
           + 2 * tile_b * tile_c * 4        # output double buffer
           + 2 * tile_c * 4                 # inv_wn tiles
           + 4 * tile_b * 4                 # inv_xn_s + label
           + tile_b * tile_c * 4)           # intermediate headroom
    vmem_limit = int(min(max(32 * 1024 * 1024, 2 * est), 96 * 1024 * 1024))

    kernel = functools.partial(_cosface_kernel,
                               sm=float(s) * float(m), tile_c=tile_c)

    out = pl.pallas_call(
        kernel,
        out_shape=jax.ShapeDtypeStruct((b_pad, c_pad), jnp.float32),
        grid_spec=pltpu.PrefetchScalarGridSpec(
            num_scalar_prefetch=0,
            # C tiles outer, B tiles inner: the weight tile's block index only
            # depends on j, so it is DMA'd once and reused across B tiles.
            grid=(n_c_tiles, n_b_tiles),
            in_specs=[
                pl.BlockSpec((tile_b, D), lambda j, i: (i, 0)),       # x
                pl.BlockSpec((tile_c, D), lambda j, i: (j, 0)),       # weight
                pl.BlockSpec((tile_b, 1), lambda j, i: (i, 0)),       # s/||x||
                pl.BlockSpec((1, tile_c), lambda j, i: (0, j)),       # 1/||w||
                pl.BlockSpec((tile_b, 1), lambda j, i: (i, 0)),       # label
            ],
            out_specs=pl.BlockSpec((tile_b, tile_c), lambda j, i: (i, j)),
        ),
        compiler_params=pltpu.CompilerParams(
            dimension_semantics=("parallel", "parallel"),
            vmem_limit_bytes=vmem_limit),
    )(x_c, w_c, inv_xn_s, inv_wn, label2d)

    if b_pad != B or c_pad != C:
        out = out[:B, :C]
    return out


def xavier_uniform(key, out_features, in_features):
    # torch.nn.init.xavier_uniform_ on a (out_features, in_features) weight.
    bound = math.sqrt(6.0 / (in_features + out_features))
    return jax.random.uniform(
        key, (out_features, in_features), dtype=jnp.float32,
        minval=-bound, maxval=bound)


# TODO(synk): the device_id != None model-parallel path (chunk weight across
# GPUs and concat) has no single-kernel equivalent; the single-device math
# implemented here is numerically identical to it.
# TODO(synk): if the logits feed softmax cross-entropy, a fused kernel that
# keeps running max / log-sum-exp in VMEM (C axis "arbitrary") would avoid
# writing the full (B, C) logits to HBM; not implemented here since the module
# returns the logits.

if __name__ == "__main__":
    B = 8              # batch
    IN_FEATURES = 32   # in_features
    OUT_FEATURES = 64  # out_features
    S, M = 64.0, 0.35

    key = jax.random.PRNGKey(0)
    kx, kw, kl = jax.random.split(key, 3)

    x = jax.random.normal(kx, (B, IN_FEATURES), dtype=jnp.float32)
    weight = xavier_uniform(kw, OUT_FEATURES, IN_FEATURES)
    label = jax.random.randint(kl, (B,), 0, OUT_FEATURES, dtype=jnp.int32)

    # Pure-JAX reference of the PyTorch forward.
    xn = x / jnp.maximum(jnp.linalg.norm(x, axis=1, keepdims=True), 1e-12)
    wn = weight / jnp.maximum(jnp.linalg.norm(weight, axis=1, keepdims=True), 1e-12)
    cosine = xn @ wn.T
    one_hot = jax.nn.one_hot(label, OUT_FEATURES, dtype=jnp.float32)
    ref = S * (one_hot * (cosine - M) + (1.0 - one_hot) * cosine)

    # Exact-precision run (f32 compute) -> tight tolerance vs the reference.
    out_f32 = cosface_forward(x, weight, label, s=S, m=M,
                              compute_dtype=jnp.float32)
    out_f32 = jax.block_until_ready(out_f32)
    assert out_f32.shape == (B, OUT_FEATURES)
    assert jnp.allclose(out_f32, ref, atol=2e-3, rtol=1e-4)

    # Default (bf16 streaming) run -> bf16-level tolerance (values are O(s)).
    out_bf16 = cosface_forward(x, weight, label, s=S, m=M)
    out_bf16 = jax.block_until_ready(out_bf16)
    assert out_bf16.shape == (B, OUT_FEATURES)
    assert jnp.max(jnp.abs(out_bf16 - ref)) < 1.0

    print("KERNEL_OK")
</pallas_src>

<mosaic_0001>
module attributes {stable_mosaic.version = 11 : i64} {
  func.func @_cosface_kernel(%arg0: i32, %arg1: i32, %arg2: memref<8x32xf32, #tpu.memory_space<vmem>>, %arg3: memref<128x32xf32, #tpu.memory_space<vmem>>, %arg4: memref<8x1xf32, #tpu.memory_space<vmem>>, %arg5: memref<1x128xf32, #tpu.memory_space<vmem>>, %arg6: memref<8x1xi32, #tpu.memory_space<vmem>>, %arg7: memref<8x128xf32, #tpu.memory_space<vmem>>) attributes {dimension_semantics = [#tpu.dimension_semantics<parallel>, #tpu.dimension_semantics<parallel>], iteration_bounds = array<i64: 1, 1>, scalar_prefetch = 0 : i64, scratch_operands = 0 : i64, tpu.core_type = #tpu.core_type<tc>, window_params = [{transform_indices = @transform_0, window_bounds = array<i64: 8, 32>}, {transform_indices = @transform_1, window_bounds = array<i64: 128, 32>}, {transform_indices = @transform_2, window_bounds = array<i64: 8, 1>}, {transform_indices = @transform_3, window_bounds = array<i64: 1, 128>}, {transform_indices = @transform_4, window_bounds = array<i64: 8, 1>}, {transform_indices = @transform_5, window_bounds = array<i64: 8, 128>}]} {
    %c0 = arith.constant 0 : index
    %c0_0 = arith.constant 0 : index
    %0 = vector.load %arg2[%c0, %c0_0] : memref<8x32xf32, #tpu.memory_space<vmem>>, vector<8x32xf32>
    %c0_1 = arith.constant 0 : index
    %c0_2 = arith.constant 0 : index
    %1 = vector.load %arg3[%c0_1, %c0_2] : memref<128x32xf32, #tpu.memory_space<vmem>>, vector<128x32xf32>
    %cst = arith.constant dense<0.000000e+00> : vector<8x128xf32>
    %2 = tpu.matmul %0, %1, %cst {dimension_numbers = #tpu.dot_dimension_numbers<[1], [1], [0], [0], [0, 0, 1, 0], [], []>} : vector<8x32xf32>, vector<128x32xf32>, vector<8x128xf32> -> vector<8x128xf32>
    %c0_3 = arith.constant 0 : index
    %c0_4 = arith.constant 0 : index
    %3 = vector.load %arg4[%c0_3, %c0_4] : memref<8x1xf32, #tpu.memory_space<vmem>>, vector<8x1xf32>
    %4 = vector.broadcast %3 : vector<8x1xf32> to vector<8x128xf32>
    %5 = arith.mulf %2, %4 : vector<8x128xf32>
    %c0_5 = arith.constant 0 : index
    %c0_6 = arith.constant 0 : index
    %6 = vector.load %arg5[%c0_5, %c0_6] : memref<1x128xf32, #tpu.memory_space<vmem>>, vector<1x128xf32>
    %7 = vector.broadcast %6 : vector<1x128xf32> to vector<8x128xf32>
    %8 = arith.mulf %5, %7 : vector<8x128xf32>
    %9 = tpu.iota {dimensions = array<i32: 1>} : vector<8x128xi32>
    %c128_i32 = arith.constant 128 : i32
    %10 = arith.muli %arg0, %c128_i32 : i32
    %11 = vector.broadcast %10 : i32 to vector<8x128xi32>
    %12 = arith.addi %9, %11 : vector<8x128xi32>
    %c0_7 = arith.constant 0 : index
    %c0_8 = arith.constant 0 : index
    %13 = vector.load %arg6[%c0_7, %c0_8] : memref<8x1xi32, #tpu.memory_space<vmem>>, vector<8x1xi32>
    %14 = vector.broadcast %13 : vector<8x1xi32> to vector<8x128xi32>
    %15 = arith.cmpi eq, %12, %14 : vector<8x128xi32>
    %cst_9 = arith.constant 2.240000e+01 : f32
    %16 = vector.broadcast %cst_9 : f32 to vector<8x128xf32>
    %17 = arith.subf %8, %16 : vector<8x128xf32>
    %18 = arith.select %15, %17, %8 : vector<8x128xi1>, vector<8x128xf32>
    %c0_10 = arith.constant 0 : index
    %c0_11 = arith.constant 0 : index
    %19 = vector.load %arg7[%c0_10, %c0_11] : memref<8x128xf32, #tpu.memory_space<vmem>>, vector<8x128xf32>
    tpu.vector_store %arg7[%c0_10, %c0_11], %18 {strides = array<i32>} : memref<8x128xf32, #tpu.memory_space<vmem>>, vector<8x128xf32>,
    return
  }
  func.func @transform_0(%arg0: i32, %arg1: i32) -> (i32, i32) {
    %c0_i32 = arith.constant 0 : i32
    %c0_i32_0 = arith.constant 0 : i32
    return %arg1, %c0_i32 : i32, i32
  }
  func.func @transform_1(%arg0: i32, %arg1: i32) -> (i32, i32) {
    %c0_i32 = arith.constant 0 : i32
    %c0_i32_0 = arith.constant 0 : i32
    return %arg0, %c0_i32 : i32, i32
  }
  func.func @transform_2(%arg0: i32, %arg1: i32) -> (i32, i32) {
    %c0_i32 = arith.constant 0 : i32
    %c0_i32_0 = arith.constant 0 : i32
    return %arg1, %c0_i32 : i32, i32
  }
  func.func @transform_3(%arg0: i32, %arg1: i32) -> (i32, i32) {
    %c0_i32 = arith.constant 0 : i32
    %c0_i32_0 = arith.constant 0 : i32
    return %c0_i32, %arg0 : i32, i32
  }
  func.func @transform_4(%arg0: i32, %arg1: i32) -> (i32, i32) {
    %c0_i32 = arith.constant 0 : i32
    %c0_i32_0 = arith.constant 0 : i32
    return %arg1, %c0_i32 : i32, i32
  }
  func.func @transform_5(%arg0: i32, %arg1: i32) -> (i32, i32) {
    %c0_i32 = arith.constant 0 : i32
    return %arg1, %arg0 : i32, i32
  }
}

</mosaic_0001>

<bundles_post_ra>
// kernel: tpu_custom_call.1
= control target key start
LH: loop header
LB: loop body
LE: loop exit
PB: predicated region body
PF: predicated region fallthrough
CT: control target
= control target key end

     0   :  { %vm38_vm0 = vcmask 261120   ;;  %v335_v2 = vmov 0.0|0.0   ;;  %vm336_vm2 = vmmov 0   ;;  %v337_v5 = vmov 0.0   ;;  %s465_s0 = inlined_call_operand.vmem [shape: f32[8,32], index: 0, kind: input, shape index: {}]   ;;  %s466_s1 = inlined_call_operand.vmem [shape: f32[128,32], index: 1, kind: input, shape index: {}]   ;;  %s467_s2 = inlined_call_operand.vmem [shape: f32[8,1], index: 2, kind: input, shape index: {}]   ;;  %s468_s3 = inlined_call_operand.vmem [shape: f32[1,128], index: 3, kind: input, shape index: {}]   ;;  %s469_s4 = inlined_call_operand.vmem [shape: s32[8,1], index: 4, kind: input, shape index: {}]   ;;  %s470_s5 = inlined_call_operand.hbm [shape: f32[8,128], index: 5, kind: output, shape index: {}]  }
   0x1   :  { %v22_v0 = vld [vmem:[%s466_s1] sm:$0xff]  ;;  %v23_v1 = vld [vmem:[%s466_s1 + $0x8] sm:$0xff]  ;;  %273 = vmatprep.subr.bf16.mxu0 %v335_v2  ;;  %vm378_vm1 = vmpackc.low %vm38_vm0, %vm38_vm0  ;;  %270 = vmatprep.mubr.msk.f32.mxu0 %vm336_vm2, %v337_v5  ;;  %v338_v6 = vmov 0  }
   0x2   :  { %v274_v3 = vpack.c.bf16 %v23_v1, %v22_v0  ;;  %310 = vset.pattern.permute.xlu0 %v338_v6  ;;  %v24_v7 = vld [vmem:[%s466_s1 + $0x10] sm:$0xff]  ;;  %v25_v8 = vld [vmem:[%s466_s1 + $0x18] sm:$0xff]  ;;  %v160_v9 = vld [vmem:[%s467_s2] sm:$0xff] }
   0x4   :  { %276 = vmatpush3.bf16.xpose.msk.msra.mxu0 %vm378_vm1, %v274_v3 }
   0x5   :  { %277 = vmatprep.subr.bf16.mxu0 %v335_v2 }
   0x6   :  { %10 = vsyncpa [#allocation3], 0  ;;  %v278_v10 = vpack.c.bf16 %v25_v8, %v24_v7  ;;  %163 = vperm.xlu0 %310, %v160_v9   ;;  %v180_v11 = vld [vmem:[%s469_s4] sm:$0xff]  ;;  %v27_v13 = vld [vmem:[%s466_s1 + $0x28] sm:$0xff]  ;;  %v175_v32 = vlaneseq }
   0x7   :  { %v26_v12 = vld [vmem:[%s466_s1 + $0x20] sm:$0xff]  ;;  %v28_v15 = vld [vmem:[%s466_s1 + $0x30] sm:$0xff]  ;;  %v29_v16 = vld [vmem:[%s466_s1 + $0x38] sm:$0xff] }
   0x8   :  { %v282_v14 = vpack.c.bf16 %v27_v13, %v26_v12  ;;  %v286_v17 = vpack.c.bf16 %v29_v16, %v28_v15  ;;  %v30_v18 = vld [vmem:[%s466_s1 + $0x40] sm:$0xff]  ;;  %v31_v19 = vld [vmem:[%s466_s1 + $0x48] sm:$0xff]  ;;  %v32_v21 = vld [vmem:[%s466_s1 + $0x50] sm:$0xff]  ;;  %v176_v37 = vand.u32 127, %v175_v32 }
   0x9   :  { %v290_v20 = vpack.c.bf16 %v31_v19, %v30_v18  ;;  %v33_v22 = vld [vmem:[%s466_s1 + $0x58] sm:$0xff]  ;;  %v34_v24 = vld [vmem:[%s466_s1 + $0x60] sm:$0xff]  ;;  %v35_v25 = vld [vmem:[%s466_s1 + $0x68] sm:$0xff] }
   0xa   :  { %182 = vperm.xlu0 %310, %v180_v11   ;;  %v294_v23 = vpack.c.bf16 %v33_v22, %v32_v21  ;;  %v298_v26 = vpack.c.bf16 %v35_v25, %v34_v24  ;;  %v36_v27 = vld [vmem:[%s466_s1 + $0x70] sm:$0xff]  ;;  %v37_v28 = vld [vmem:[%s466_s1 + $0x78] sm:$0xff]  ;;  %v21_v30 = vld [vmem:[%s465_s0] sm:$0xff]  ;;  %s339_s1 = smov [#allocation2]  }
   0xb   :  { %v302_v29 = vpack.c.bf16 %v37_v28, %v36_v27  ;;  %v219_v34 = vld [vmem:[%s468_s3] ss:$0 sm:$0xff]  ;;  %s194_s6 = sshll.u32 %s339_s1, 4  ;;  %s195_s6 = int_to_ptr.vmem [resolvable:$true] %s194_s6 }
   0xc   :  { %280 = vmatpush3.bf16.xpose.msk.msra.mxu0 %vm378_vm1, %v278_v10  ;;  %s311_s0 = scalar_lea.vmem %s195_s6, 128  ;;  %p316_p1 = scmp.lt.s32.totalorder %s195_s6, %s195_s6 }
   0xd   :  { %281 = vmatprep.subr.bf16.mxu0 %v335_v2  ;;  %p312_p0 = scmp.ne.s32.totalorder %s195_s6, %s311_s0  ;;  %p317_p2 = scmp.lt.s32.totalorder %s311_s0, %s311_s0 }
   0xf   :  { %p318_p3 = por %p317_p2, %p316_p1 }
  0x11   :  { %p319_p4 = pnand %p318_p3, %p312_p0 }
  0x14   :  { %284 = vmatpush3.bf16.xpose.msk.msra.mxu0 %vm378_vm1, %v282_v14 }
  0x15   :  { %285 = vmatprep.subr.bf16.mxu0 %v335_v2 }
  0x1c   :  { %288 = vmatpush3.bf16.xpose.msk.msra.mxu0 %vm378_vm1, %v286_v17 }
  0x1d   :  { %289 = vmatprep.subr.bf16.mxu0 %v335_v2 }
  0x24   :  { %292 = vmatpush3.bf16.xpose.msk.msra.mxu0 %vm378_vm1, %v290_v20 }
  0x25   :  { %293 = vmatprep.subr.bf16.mxu0 %v335_v2 }
  0x2c   :  { %296 = vmatpush3.bf16.xpose.msk.msra.mxu0 %vm378_vm1, %v294_v23 }
  0x2d   :  { %297 = vmatprep.subr.bf16.mxu0 %v335_v2 }
  0x34   :  { %300 = vmatpush3.bf16.xpose.msk.msra.mxu0 %vm378_vm1, %v298_v26 }
  0x35   :  { %301 = vmatprep.subr.bf16.mxu0 %v335_v2 }
  0x3c   :  { %304 = vmatpush3.bf16.xpose.msk.msra.mxu0 %vm378_vm1, %v302_v29 }
  0x43   :  { %271 = vmatmul.mubr.msk.f32.vlgmr.msra.gmra.mrb[0].mxu0 %vm38_vm0, %v21_v30 }
  0x85   :  { %v164_v31 = vpop.permute.xlu0 %163 }
  0x89   :  { %v183_v38 = vpop.permute.xlu0 %182 }
  0x8a   :  { %vm184_vm3 = vcmp.eq.s32.totalorder %v176_v37, %v183_v38 }
 0x116   :  { %v156_v33 = vpop.f32.mrb[0].mxu0 }
 0x117   :  { %v166_v35 = vmul.f32 %v164_v31, %v156_v33  ;;  %v272_v36 = vpop.f32.mrb[1].mxu0 }
 0x119   :  { %v174_v39 = vmul.f32 %v219_v34, %v166_v35 }
 0x11b   :  { %v220_v40 = vadd.f32 -22.4, %v174_v39 }
 0x11d   :  { %v186_v41 = vsel %vm184_vm3, %v220_v40, %v174_v39 }
 0x11e   :  { %187 = vst [vmem:[#allocation2] sm:$0xff] %v186_v41 }
 0x11f   :  { %322 = shalt.err (!%p319_p4)
}
 0x120   :  { %s323_s8 = scalar_lea.hbm %s470_s5, 128 }
 0x121   :  { %p324_p5 = scmp.ne.s32.totalorder %s470_s5, %s323_s8  ;;  %p327_p6 = scmp.lt.u32.totalorder %s323_s8, %s470_s5 }
 0x123   :  { %p329_p7 = pnand %p327_p6, %p324_p5 }
 0x125   :  { %332 = shalt.err (!%p329_p7)
}
 0x126   :  { %197 = dma.vmem_to_hbm [thread:$0]  %s195_s6, 128, %s470_s5, [#allocation3]  }
 0x127   :  { %333 = dma.done.wait [#allocation3], 128  }
 0x128   :  { %334 = vsyncadd [#allocation3], 4294967168 }
 0x129   :  { %201 = vsyncpa [#allocation3], 1 }

</bundles_post_ra>
